<compile_context>
chip_gen: v6e
topology: v6e:2x2x1
jax: 0.10.0
libtpu: 0.0.40
codegen_flags: <defaults>
</compile_context>

<pallas_src>
import functools

import jax
import jax.numpy as jnp
from jax.experimental import pallas as pl
from jax.experimental.pallas import tpu as pltpu


# ---------------------------------------------------------------------------
# Kernel
# ---------------------------------------------------------------------------
def _ema_kernel(l_ref, w_ref, x_ref, trend_ref, seas_ref, carry_ref, *,
                t_sub, n_sub):
    """One grid step = (batch tile, time block).

    l_ref     : (t_sub, t_sub) f32  lower-triangular EMA weights
                L[i, j] = alpha * (1-alpha)**(i-j) for j <= i else 0
    w_ref     : (t_sub, 1)     f32  carry weights (1-alpha)**(i+1)
    x_ref     : (b_tile, n_sub*t_sub, D) input tile
    trend_ref : (b_tile, n_sub*t_sub, D) output tile
    seas_ref  : (b_tile, n_sub*t_sub, D) output tile
    carry_ref : (b_tile, 1, D) f32 scratch; trend at the last row of the
                previous time block (persists across grid iterations).
    """
    t_blk = pl.program_id(1)
    b_tile = x_ref.shape[0]

    # First time block of every batch tile (time axis restarts at 0 per batch
    # tile): seed the carry with x[:, 0] so trend[0] == alpha*x0+(1-a)*x0 = x0.
    @pl.when(t_blk == 0)
    def _():
        carry_ref[...] = x_ref[:, 0:1, :].astype(jnp.float32)

    L = l_ref[...]                      # (t_sub, t_sub) f32
    w = w_ref[...]                      # (t_sub, 1)     f32

    for b in range(b_tile):
        carry = carry_ref[b]            # (1, D) f32
        for s in range(n_sub):
            lo, hi = s * t_sub, (s + 1) * t_sub
            x_sub = x_ref[b, lo:hi, :].astype(jnp.float32)          # (t_sub, D)
            # Whole within-sub-block recurrence as one MXU matmul (kept in
            # f32 / HIGHEST precision so 1e-5 parity with the scalar loop).
            trend = jnp.dot(L, x_sub,
                            preferred_element_type=jnp.float32,
                            precision=jax.lax.Precision.HIGHEST)
            trend = trend + w * carry                                # (t_sub, D)
            trend_ref[b, lo:hi, :] = trend.astype(trend_ref.dtype)
            seas_ref[b, lo:hi, :] = (x_sub - trend).astype(seas_ref.dtype)
            carry = trend[t_sub - 1:t_sub, :]                        # (1, D)
        carry_ref[b] = carry


# ---------------------------------------------------------------------------
# Tiling heuristics
# ---------------------------------------------------------------------------
def _round_up(n, m):
    return ((n + m - 1) // m) * m


def _largest_divisor_leq(n, cap):
    for c in range(min(n, cap), 0, -1):
        if n % c == 0:
            return c
    return 1


def _pick_t_sub(t_block):
    """Matmul sub-block length (<=128) that divides t_block."""
    if t_block <= 128:
        return t_block
    for cand in (128, 64, 32, 16, 8):
        if t_block % cand == 0:
            return cand
    return t_block


def _choose_config(B, S, D, itemsize):
    """Returns (b_tile, t_block, t_sub, vmem_limit_bytes)."""
    try:
        vmem_cap = int(getattr(pltpu.get_tpu_info(), "vmem_capacity_bytes",
                               64 * 1024 * 1024))
    except Exception:
        vmem_cap = 64 * 1024 * 1024
    if vmem_cap >= 100 * 1024 * 1024:        # v5e / v6e: 128 MiB physical VMEM
        budget, vmem_limit = 56 * 1024 * 1024, 96 * 1024 * 1024
    else:                                    # v7x: 64 MiB per TensorCore
        budget, vmem_limit = 20 * 1024 * 1024, 40 * 1024 * 1024

    # Batch tile: small (bounds carry / temporary vreg+VMEM pressure); prefer
    # >= 2 tiles on the parallel axis so both v7x TensorCores get work.
    b_tile = _largest_divisor_leq(B, 8)
    for cand in range(min(B, 8), 0, -1):
        if B % cand == 0 and B // cand >= 2:
            b_tile = cand
            break

    def rows_budget(bt):
        per_row = 3 * 2 * bt * D * itemsize      # x+trend+seas, double-buffered
        return max(8, budget // max(per_row, 1))

    # Matmul sub-block: <=128 keeps arithmetic intensity ~t_sub/6 flop/byte,
    # i.e. memory-bound on every generation.
    t_sub = min(128, _round_up(S, 8))
    while b_tile > 1 and t_sub > rows_budget(b_tile):
        b_tile = _largest_divisor_leq(B, b_tile - 1)
    max_rows = rows_budget(b_tile)
    if t_sub > max_rows:
        t_sub = max(8, (max_rows // 8) * 8)

    # DMA time block = a few sub-blocks (bounded unroll), limited by VMEM and
    # by how much sequence padding we are willing to accept (~25% of S).
    n_sub = max(1, min(4, max_rows // t_sub, _round_up(S, t_sub) // t_sub))
    while n_sub > 1 and (_round_up(S, n_sub * t_sub) - S) * 4 > S:
        n_sub -= 1
    t_block = n_sub * t_sub
    return b_tile, t_block, t_sub, vmem_limit


# ---------------------------------------------------------------------------
# Wrapper
# ---------------------------------------------------------------------------
def ema_decomposition(x: jax.Array, alpha: float = 0.1, *,
                      t_block: int | None = None, b_tile: int | None = None):
    """x: [B, S, D] -> (trend, seasonality), each [B, S, D]."""
    B, S, D = x.shape
    itemsize = jnp.dtype(x.dtype).itemsize
    auto_b, auto_tb, auto_ts, vmem_limit = _choose_config(B, S, D, itemsize)

    b_tile = auto_b if b_tile is None else b_tile
    if B % b_tile != 0:
        raise ValueError(f"b_tile={b_tile} must divide B={B}")
    if t_block is None:
        t_block, t_sub = auto_tb, auto_ts
    else:
        if t_block % 8 != 0:
            raise ValueError("t_block must be a multiple of 8")
        t_sub = _pick_t_sub(t_block)
    n_sub = t_block // t_sub

    # Pad the sequence so every time block is full; sliced off afterwards.
    S_pad = _round_up(S, t_block)
    x_in = x if S_pad == S else jnp.pad(x, ((0, 0), (0, S_pad - S), (0, 0)))

    # EMA weight matrix / carry weights for one sub-block (f32).
    i = jnp.arange(t_sub, dtype=jnp.float32)
    decay = jnp.float32(1.0 - alpha)
    diff = i[:, None] - i[None, :]
    L = jnp.where(diff >= 0,
                  jnp.float32(alpha) * jnp.power(decay, diff),
                  jnp.float32(0.0)).astype(jnp.float32)
    w = jnp.power(decay, i + 1.0)[:, None].astype(jnp.float32)   # (t_sub, 1)

    kernel = functools.partial(_ema_kernel, t_sub=t_sub, n_sub=n_sub)
    grid = (B // b_tile, S_pad // t_block)
    blk = (b_tile, t_block, D)
    idx = lambda bi, ti: (bi, ti, 0)
    const_idx = lambda bi, ti: (0, 0)

    flops = 2 * B * S_pad * t_sub * D + 4 * B * S_pad * D
    bytes_accessed = 3 * B * S_pad * D * itemsize

    trend, seasonality = pl.pallas_call(
        kernel,
        out_shape=(
            jax.ShapeDtypeStruct((B, S_pad, D), x.dtype),
            jax.ShapeDtypeStruct((B, S_pad, D), x.dtype),
        ),
        grid_spec=pltpu.PrefetchScalarGridSpec(
            num_scalar_prefetch=0,
            grid=grid,
            in_specs=[
                pl.BlockSpec((t_sub, t_sub), const_idx),   # L (resident)
                pl.BlockSpec((t_sub, 1), const_idx),       # w (resident)
                pl.BlockSpec(blk, idx),                    # x
            ],
            out_specs=(pl.BlockSpec(blk, idx), pl.BlockSpec(blk, idx)),
            scratch_shapes=[pltpu.VMEM((b_tile, 1, D), jnp.float32)],
        ),
        compiler_params=pltpu.CompilerParams(
            # batch tiles are independent; time blocks are a recurrence
            dimension_semantics=("parallel", "arbitrary"),
            vmem_limit_bytes=vmem_limit,
        ),
        cost_estimate=pl.CostEstimate(
            flops=int(flops), transcendentals=0,
            bytes_accessed=int(bytes_accessed)),
    )(L, w, x_in)

    if S_pad != S:
        trend = trend[:, :S, :]
        seasonality = seasonality[:, :S, :]
    return trend, seasonality


# ---------------------------------------------------------------------------
# Pure-JAX reference (matches the PyTorch loop)
# ---------------------------------------------------------------------------
def _ema_reference(x: jax.Array, alpha: float = 0.1):
    x_sbd = jnp.transpose(x, (1, 0, 2)).astype(jnp.float32)   # [S, B, D]

    def step(prev_trend, x_t):
        new_trend = alpha * x_t + (1.0 - alpha) * prev_trend
        return new_trend, new_trend

    init = x_sbd[0]
    _, rest = jax.lax.scan(step, init, x_sbd[1:])
    trend_sbd = jnp.concatenate([init[None], rest], axis=0)
    trend = jnp.transpose(trend_sbd, (1, 0, 2)).astype(x.dtype)
    return trend, x - trend


if __name__ == "__main__":
    ema_fn = jax.jit(ema_decomposition,
                     static_argnames=("alpha", "t_block", "b_tile"))

    def check(x, **kw):
        trend, seas = ema_fn(x, **kw)
        jax.block_until_ready((trend, seas))
        t_ref, s_ref = _ema_reference(x)
        assert trend.shape == x.shape and seas.shape == x.shape
        assert jnp.allclose(trend, t_ref, atol=2e-5, rtol=2e-5), \
            float(jnp.max(jnp.abs(trend - t_ref)))
        assert jnp.allclose(seas, s_ref, atol=2e-5, rtol=2e-5), \
            float(jnp.max(jnp.abs(seas - s_ref)))

    key = jax.random.PRNGKey(0)
    k1, k2, k3, k4 = jax.random.split(key, 4)

    # Shape implied by the module: [batch_size, seq_len, input_dim].
    check(jax.random.normal(k1, (2, 8, 32), dtype=jnp.float32))
    # Multiple time blocks per batch tile: carry chained across grid steps.
    check(jax.random.normal(k2, (2, 32, 128), dtype=jnp.float32), t_block=8)
    # seq_len not a multiple of 8: exercises the padded-tail path.
    check(jax.random.normal(k3, (2, 20, 128), dtype=jnp.float32))
    # b_tile > 1 and several matmul sub-blocks inside one grid step.
    check(jax.random.normal(k4, (4, 256, 128), dtype=jnp.float32))

    print("KERNEL_OK")
</pallas_src>

<mosaic_0001>
module attributes {stable_mosaic.version = 11 : i64} {
  func.func @_ema_kernel(%arg0: i32, %arg1: i32, %arg2: memref<8x8xf32, #tpu.memory_space<vmem>>, %arg3: memref<8x1xf32, #tpu.memory_space<vmem>>, %arg4: memref<1x8x32xf32, #tpu.memory_space<vmem>>, %arg5: memref<1x8x32xf32, #tpu.memory_space<vmem>>, %arg6: memref<1x8x32xf32, #tpu.memory_space<vmem>>, %arg7: memref<1x1x32xf32, #tpu.memory_space<vmem>>) attributes {dimension_semantics = [#tpu.dimension_semantics<parallel>, #tpu.dimension_semantics<arbitrary>], iteration_bounds = array<i64: 2, 1>, scalar_prefetch = 0 : i64, scratch_operands = 1 : i64, tpu.core_type = #tpu.core_type<tc>, window_params = [{pipeline_mode = #tpu.pipeline_mode<synchronous>, transform_indices = @transform_0, window_bounds = array<i64: 8, 8>}, {pipeline_mode = #tpu.pipeline_mode<synchronous>, transform_indices = @transform_1, window_bounds = array<i64: 8, 1>}, {transform_indices = @transform_2, window_bounds = array<i64: 1, 8, 32>}, {transform_indices = @transform_3, window_bounds = array<i64: 1, 8, 32>}, {transform_indices = @transform_4, window_bounds = array<i64: 1, 8, 32>}]} {
    %c0_i32 = arith.constant 0 : i32
    %0 = arith.cmpi eq, %arg1, %c0_i32 : i32
    %1 = arith.extui %0 : i1 to i32
    %c0_i32_0 = arith.constant 0 : i32
    %2 = arith.cmpi ne, %1, %c0_i32_0 : i32
    scf.if %2 {
      %c0_19 = arith.constant 0 : index
      %c0_20 = arith.constant 0 : index
      %c0_21 = arith.constant 0 : index
      %25 = vector.load %arg4[%c0_19, %c0_20, %c0_21] : memref<1x8x32xf32, #tpu.memory_space<vmem>>, vector<1x1x32xf32>
      %c0_22 = arith.constant 0 : index
      %c0_23 = arith.constant 0 : index
      %c0_24 = arith.constant 0 : index
      %26 = vector.load %arg7[%c0_22, %c0_23, %c0_24] : memref<1x1x32xf32, #tpu.memory_space<vmem>>, vector<1x1x32xf32>
      tpu.vector_store %arg7[%c0_22, %c0_23, %c0_24], %25 {strides = array<i32>} : memref<1x1x32xf32, #tpu.memory_space<vmem>>, vector<1x1x32xf32>,
    } else {
    }
    %c0 = arith.constant 0 : index
    %c0_1 = arith.constant 0 : index
    %3 = vector.load %arg2[%c0, %c0_1] : memref<8x8xf32, #tpu.memory_space<vmem>>, vector<8x8xf32>
    %c0_2 = arith.constant 0 : index
    %c0_3 = arith.constant 0 : index
    %4 = vector.load %arg3[%c0_2, %c0_3] : memref<8x1xf32, #tpu.memory_space<vmem>>, vector<8x1xf32>
    %c0_4 = arith.constant 0 : index
    %c0_5 = arith.constant 0 : index
    %c0_6 = arith.constant 0 : index
    %5 = vector.load %arg7[%c0_4, %c0_5, %c0_6] : memref<1x1x32xf32, #tpu.memory_space<vmem>>, vector<1x1x32xf32>
    %6 = vector.shape_cast %5 : vector<1x1x32xf32> to vector<1x32xf32>
    %c0_7 = arith.constant 0 : index
    %c0_8 = arith.constant 0 : index
    %c0_9 = arith.constant 0 : index
    %7 = vector.load %arg4[%c0_7, %c0_8, %c0_9] : memref<1x8x32xf32, #tpu.memory_space<vmem>>, vector<1x8x32xf32>
    %8 = vector.shape_cast %7 : vector<1x8x32xf32> to vector<8x32xf32>
    %cst = arith.constant dense<0.000000e+00> : vector<8x32xf32>
    %9 = tpu.matmul %3, %8, %cst {dimension_numbers = #tpu.dot_dimension_numbers<[1], [0], [0], [1], [0, 0, 1, 1], [], []>, precision = #tpu.contract_precision<fp32>} : vector<8x8xf32>, vector<8x32xf32>, vector<8x32xf32> -> vector<8x32xf32>
    %10 = vector.broadcast %4 : vector<8x1xf32> to vector<8x32xf32>
    %11 = vector.broadcast %6 : vector<1x32xf32> to vector<8x32xf32>
    %12 = arith.mulf %10, %11 : vector<8x32xf32>
    %13 = arith.addf %9, %12 : vector<8x32xf32>
    %c0_10 = arith.constant 0 : index
    %c0_11 = arith.constant 0 : index
    %c0_12 = arith.constant 0 : index
    %14 = vector.load %arg5[%c0_10, %c0_11, %c0_12] : memref<1x8x32xf32, #tpu.memory_space<vmem>>, vector<1x8x32xf32>
    %15 = vector.shape_cast %14 : vector<1x8x32xf32> to vector<8x32xf32>
    %16 = vector.shape_cast %13 : vector<8x32xf32> to vector<1x8x32xf32>
    tpu.vector_store %arg5[%c0_10, %c0_11, %c0_12], %16 {strides = array<i32>} : memref<1x8x32xf32, #tpu.memory_space<vmem>>, vector<1x8x32xf32>,
    %17 = arith.subf %8, %13 : vector<8x32xf32>
    %c0_13 = arith.constant 0 : index
    %c0_14 = arith.constant 0 : index
    %c0_15 = arith.constant 0 : index
    %18 = vector.load %arg6[%c0_13, %c0_14, %c0_15] : memref<1x8x32xf32, #tpu.memory_space<vmem>>, vector<1x8x32xf32>
    %19 = vector.shape_cast %18 : vector<1x8x32xf32> to vector<8x32xf32>
    %20 = vector.shape_cast %17 : vector<8x32xf32> to vector<1x8x32xf32>
    tpu.vector_store %arg6[%c0_13, %c0_14, %c0_15], %20 {strides = array<i32>} : memref<1x8x32xf32, #tpu.memory_space<vmem>>, vector<1x8x32xf32>,
    %21 = vector.extract_strided_slice %13 {offsets = [7, 0], sizes = [1, 32], strides = [1, 1]} : vector<8x32xf32> to vector<1x32xf32>
    %c0_16 = arith.constant 0 : index
    %c0_17 = arith.constant 0 : index
    %c0_18 = arith.constant 0 : index
    %22 = vector.load %arg7[%c0_16, %c0_17, %c0_18] : memref<1x1x32xf32, #tpu.memory_space<vmem>>, vector<1x1x32xf32>
    %23 = vector.shape_cast %22 : vector<1x1x32xf32> to vector<1x32xf32>
    %24 = vector.shape_cast %21 : vector<1x32xf32> to vector<1x1x32xf32>
    tpu.vector_store %arg7[%c0_16, %c0_17, %c0_18], %24 {strides = array<i32>} : memref<1x1x32xf32, #tpu.memory_space<vmem>>, vector<1x1x32xf32>,
    return
  }
  func.func @transform_0(%arg0: i32, %arg1: i32) -> (i32, i32) {
    %c0_i32 = arith.constant 0 : i32
    %c0_i32_0 = arith.constant 0 : i32
    %c0_i32_1 = arith.constant 0 : i32
    return %c0_i32, %c0_i32_0 : i32, i32
  }
  func.func @transform_1(%arg0: i32, %arg1: i32) -> (i32, i32) {
    %c0_i32 = arith.constant 0 : i32
    %c0_i32_0 = arith.constant 0 : i32
    %c0_i32_1 = arith.constant 0 : i32
    return %c0_i32, %c0_i32_0 : i32, i32
  }
  func.func @transform_2(%arg0: i32, %arg1: i32) -> (i32, i32, i32) {
    %c0_i32 = arith.constant 0 : i32
    %c0_i32_0 = arith.constant 0 : i32
    return %arg0, %arg1, %c0_i32 : i32, i32, i32
  }
  func.func @transform_3(%arg0: i32, %arg1: i32) -> (i32, i32, i32) {
    %c0_i32 = arith.constant 0 : i32
    %c0_i32_0 = arith.constant 0 : i32
    return %arg0, %arg1, %c0_i32 : i32, i32, i32
  }
  func.func @transform_4(%arg0: i32, %arg1: i32) -> (i32, i32, i32) {
    %c0_i32 = arith.constant 0 : i32
    %c0_i32_0 = arith.constant 0 : i32
    return %arg0, %arg1, %c0_i32 : i32, i32, i32
  }
}

</mosaic_0001>

<bundles_post_ra>
// kernel: ema_decomposition.1
= control target key start
LH: loop header
LB: loop body
LE: loop exit
PB: predicated region body
PF: predicated region fallthrough
CT: control target
= control target key end

     0   :  { %10 = vsyncpa [#allocation4], 0  ;;  %s1273_s0 = inlined_call_operand.vmem [shape: f32[8,8], index: 0, kind: input, shape index: {}]   ;;  %s1274_s1 = inlined_call_operand.vmem [shape: f32[8,1], index: 1, kind: input, shape index: {}]   ;;  %s1275_s2 = inlined_call_operand.vmem [shape: f32[2,8,32], index: 2, kind: input, shape index: {}]   ;;  %s1276_s3 = inlined_call_operand.hbm [shape: f32[2,8,32], index: 3, kind: output, shape index: {0}]   ;;  %s1277_s4 = inlined_call_operand.hbm [shape: f32[2,8,32], index: 4, kind: output, shape index: {1}]  }
   0x1   :  { %12 = vsyncpa [#allocation4 + $0x1], 0 }
   0x2   :  { %13 = vsyncpa [#allocation6], 0 }
   0x3   :  { %15 = vsyncpa [#allocation6 + $0x1], 0  ;;  %s1107_s15 = smov 0   ;;  %s1109_s16 = smov 0  }
   0x4   :  { %s1111_s17 = smov 0   ;;  %s1113_s18 = smov 0  }
   0x5   :  { %s1115_s19 = smov 0   ;;  %s1117_s20 = smov 0  }
   0x6 LB: > { %s848_s21 = sadd.s32 4294967295, %s1075_s20   ;;  %s849_s22 = sadd.s32 4294967294, %s1075_s20   ;;  %s1075_s20 = sphi %s1117_s20, %s21_s20   ;;  %s1071_s19 = sphi %s1115_s19, %s1284_s19   ;;  %s1067_s18 = sphi %s1113_s18, %s1283_s18   ;;  %s1063_s17 = sphi %s1111_s17, %s1282_s17   ;;  %s1059_s16 = sphi %s1109_s16, %s1281_s16   ;;  %s1055_s15 = sphi %s1107_s15, %s1280_s15  }
   0x7   : > { %s33_s23 = sadd.s32 1, %s1071_s19  ;;  %s112_s24 = sadd.s32 1, %s1063_s17 }
   0x8   : > { %p35_p0 = scmp.ge.s32.totalorder %s33_s23, 2  ;;  %p122_p1 = scmp.ne.s32.totalorder %s1063_s17, %s1059_s16 }
   0x9   : > { %p123_p2 = scmp.eq.s32.totalorder %s848_s21, 1  ;;  %p128_p3 = scmp.ne.s32.totalorder %s1059_s16, %s1055_s15 }
   0xa   : > { %s1286_s23 = smov (%p35_p0, %s33_s23), 0  ;;  %p129_p5 = scmp.eq.s32.totalorder %s849_s22, 1 }
   0xb   : > { %p1147_p4 = por %p123_p2, %p122_p1  ;;  %s107_s26 = ssub.s32 %s1071_s19, %s1286_s23 }
   0xc   : > { %p852_p6 = scmp.ge.s32.totalorder %s1075_s20, 1  ;;  %p110_p7 = scmp.eq.s32.totalorder %s107_s26, 0 }
   0xd   : > { %p1154_p8 = por %p129_p5, %p128_p3  ;;  %p191_p9 = scmp.lt.s32.totalorder %s1075_s20, 3 }
   0xe   : > { %s1160_s28 = scalar_select %p110_p7, %s1063_s17, %s112_s24  }
   0xf   : > { %p192_p10 = pnand %p852_p6, %p191_p9 }
  0x10   : > { %p224_p11 = scmp.lt.s32.totalorder (!%p192_p10), %s1067_s18, 1  ;;  %s1184_s12 = sand.u32 (!%p192_p10), 1, %s1059_s16  }
  0x11   : > { %195 = sbr.rel (%p192_p10) target bundleno = 278 (0x116), region = 32  ;;  %s853_s13 = sshll.u32 (!%p192_p10), %s1184_s12, 3 }
  0x12   : > { %s859_s14 = sshll.u32 (!%p192_p10), %s1067_s18, 7  ;;  %s216_s21 = scalar_lea.vmem (!%p192_p10), [#allocation3], %s853_s13 }
  0x13   : > { %s730_s22 = sshll.u32 (!%p192_p10), %s216_s21, 4  ;;  %s1188_s24 = scalar_lea.vmem (!%p192_p10), [#allocation5], %s853_s13  ;;  %s1196_s22 = int_to_ptr.vmem [resolvable:$true] %s730_s22 }
  0x14   : > { %s744_s26 = sshll.u32 (!%p192_p10), %s1188_s24, 4  ;;  %s1194_s5 = scalar_lea.hbm (!%p192_p10), %s1276_s3, %s859_s14  ;;  %s1205_s26 = int_to_ptr.vmem [resolvable:$true] %s744_s26 }
  0x15   : > { %s969_s9 = scalar_lea.vmem (!%p192_p10), %s1196_s22, 128  ;;  %s1080_s10 = smov (!%p192_p10), [#allocation3]  }
  0x16   : > { %v238_v0 = vld [vmem:[%s1273_s0] sm:$0xff]  ;;  %vm254_vm0 = vcmask 64512   ;;  %v1077_v1 = vmov 0.0   ;;  %vm1078_vm1 = vmmov 0   ;;  %s225_s7 = scalar_select %p224_p11, %s1067_s18, 1  ;;  %v1079_v5 = vmov 0  }
  0x17   : > { %875 = vmatprep.subr.mxu0 %v1077_v1  ;;  %877 = vmatprep.mubr.msk.f32.mxu0 %vm1078_vm1, %v1077_v1  ;;  %v256_v2 = vsel %vm254_vm0, %v238_v0, 0  ;;  %v239_v3 = vld [vmem:[%s1274_s1] sm:$0xff]  ;;  %vm236_vm2 = vcmask 253952   ;;  %vm708_vm3 = vcmask 261127   ;;  %vm704_vm4 = vcmask 261120   ;;  %p970_p12 = scmp.ne.s32.totalorder %s1196_s22, %s969_s9 }
  0x18   : > { %v324_v4 = vand.u32 4294901760, %v256_v2  ;;  %880 = vmatprep.subr.mxu1 %v1077_v1  ;;  %882 = vmatprep.mubr.msk.f32.mxu1 %vm1078_vm1, %v1077_v1  ;;  %s855_s8 = sshll.u32 %s225_s7, 3  ;;  %s1203_s7 = scalar_lea.hbm %s1277_s4, %s859_s14 }
  0x19   : > { %968 = vset.pattern.permute.xlu0 %v1079_v5  ;;  %s230_s11 = scalar_lea.vmem %s1275_s2, %s855_s8  ;;  %s711_s8 = scalar_lea.sflag [#allocation4], %s1184_s12 }
  0x1a   : > { %v325_v6 = vsub.f32 %v256_v2, %v324_v4  ;;  %244 = vperm.xlu0 %968, %v239_v3   ;;  %v235_v7 = vld [vmem:[%s230_s11] sm:$0x1]  ;;  %p971_p13 = pnand %p970_p12, %p1147_p4 }
  0x1b   : > { %v1175_v8 = vld [vmem:[%s230_s11] sm:$0xff]  ;;  %237 = vst.msk [vmem:[#allocation2] sm:$0x1] %vm236_vm2, %v235_v7  ;;  %s973_s11 = sshll.u32 %s1080_s10, 4  ;;  %s974_s11 = int_to_ptr.vmem [resolvable:$false] %s973_s11 }
  0x1c   : > { %v326_v9 = vand.u32 4294901760, %v325_v6  ;;  %v289_v10 = vand.u32 4294901760, %v1175_v8  ;;  %p972_p0 = pneg %p971_p13  ;;  %s975_s13 = scalar_lea.vmem %s974_s11, 256 }
  0x1d   : > { %p976_p1 = scmp.lt.s32.totalorder %s1196_s22, %s974_s11  ;;  %p977_p2 = scmp.lt.s32.totalorder %s975_s13, %s969_s9 }
  0x1e   : > { %v327_v11 = vsub.f32 %v325_v6, %v326_v9  ;;  %876 = vmatpush3.msra.mxu0 %v289_v10  ;;  %v366_v12 = vsub.f32 %v1175_v8, %v289_v10 }
  0x1f   : > { %885 = vmatprep.subr.mxu0 %v1077_v1  ;;  %p978_p3 = por %p977_p2, %p976_p1 }
  0x20   : > { %v328_v13 = vand.u32 4294901760, %v327_v11  ;;  %v367_v14 = vand.u32 4294901760, %v366_v12 }
  0x21   : > { %p979_p5 = pnand %p978_p3, %p972_p0 }
  0x22   : > { %878 = vmatmul.mubr.f32.vlgmr.msra.gmra.mxu0 %v328_v13  ;;  %v368_v15 = vsub.f32 %v366_v12, %v367_v14  ;;  %v856_v18 = vld [vmem:[#allocation2] ss:$0 sm:$0xff] }
  0x23   : > { %886 = vmatpush3.msra.mxu0 %v366_v12  ;;  %887 = vmatprep.mubr.msk.f32.mxu0 %vm1078_vm1, %v1077_v1 }
  0x24   : > { %895 = vmatprep.subr.mxu0 %v1077_v1  ;;  %v369_v16 = vand.u32 4294901760, %v368_v15 }
  0x26   : > { %888 = vmatmul.mubr.f32.vlgmr.msra.gmra.mxu0 %v325_v6  ;;  %881 = vmatpush3.msra.mxu1 %v369_v16 }
  0x27   : > { %896 = vmatpush3.msra.mxu0 %v367_v14  ;;  %883 = vmatmul.mubr.f32.vlgmr.msra.gmra.mxu1 %v324_v4 }
  0x28   : > { %890 = vmatprep.subr.mxu1 %v1077_v1  ;;  %892 = vmatprep.mubr.msk.f32.mxu1 %vm1078_vm1, %v1077_v1 }
  0x29   : > { %891 = vmatpush3.msra.mxu1 %v289_v10  ;;  %897 = vmatprep.mubr.msk.f32.mxu0 %vm1078_vm1, %v1077_v1 }
  0x2a   : > { %900 = vmatprep.subr.mxu1 %v1077_v1  ;;  %898 = vmatmul.mubr.f32.vlgmr.msra.gmra.mxu0 %v324_v4 }
  0x2b   : > { %893 = vmatmul.mubr.f32.vlgmr.msra.gmra.mxu1 %v326_v9 }
  0x2c   : > { %901 = vmatpush3.msra.mxu1 %v289_v10  ;;  %902 = vmatprep.mubr.msk.f32.mxu1 %vm1078_vm1, %v1077_v1 }
  0x2f   : > { %903 = vmatmul.mubr.f32.vlgmr.msra.gmra.mxu1 %v324_v4 }
  0x95   : > { %v245_v17 = vpop.permute.xlu0 %244 }
  0x96   : > { %v253_v19 = vmul.f32 %v856_v18, %v245_v17 }
  0xe2   : > { %v330_v20 = vpop.f32.mrf.mxu0 }
  0xe3   : > { %v331_v22 = vadd.f32 %v330_v20, %v253_v19 }
  0xe4   : > { %v879_v21 = vpop.f32.mrf.mxu0 }
  0xe6   : > { %v480_v23 = vpop.f32.mrf.mxu0 }
  0xe7   : > { %v406_v24 = vpop.f32.mrf.mxu1 }
  0xe8   : > { %v889_v25 = vpop.f32.mrf.mxu0  ;;  %v407_v26 = vadd.f32 %v406_v24, %v331_v22 }
  0xe9   : > { %v884_v27 = vpop.f32.mrf.mxu1 }
  0xea   : > { %v481_v28 = vadd.f32 %v480_v23, %v407_v26  ;;  %v628_v29 = vpop.f32.mrf.mxu0 }
  0xeb   : > { %v554_v30 = vpop.f32.mrf.mxu1 }
  0xec   : > { %v555_v31 = vadd.f32 %v554_v30, %v481_v28  ;;  %v899_v32 = vpop.f32.mrf.mxu0 }
  0xed   : > { %v894_v33 = vpop.f32.mrf.mxu1 }
  0xee   : > { %v629_v34 = vadd.f32 %v628_v29, %v555_v31 }
  0xef   : > { %v700_v35 = vpop.f32.mrf.mxu1 }
  0xf0   : > { %v701_v36 = vadd.f32 %v700_v35, %v629_v34 }
  0xf1   : > { %v904_v37 = vpop.f32.mrf.mxu1 }
  0xf2   : > { %v706_v38 = vsub.f32 %v1175_v8, %v701_v36  ;;  %709 = vst.msk [vmem:[#allocation2 - $0x7] sm:$0x80] %vm708_vm3, %v701_v36 }
  0xf3   : > { %705 = vst.msk [vmem:[%s216_s21] sm:$0xff] %vm704_vm4, %v701_v36 }
  0xf4   : > { %982 = shalt.err (!%p979_p5)
}
  0xf5   : > { %s983_s14 = scalar_lea.hbm %s1194_s5, 128  ;;  %s987_s30 = scalar_lea.hbm %s1276_s3, 256 }
  0xf6   : > { %p984_p6 = scmp.ne.s32.totalorder %s1194_s5, %s983_s14  ;;  %p988_p10 = scmp.lt.s32.totalorder %s1194_s5, %s1276_s3 }
  0xf7   : > { %p989_p11 = scmp.lt.s32.totalorder %s987_s30, %s983_s14 }
  0xf8   : > { %p985_p7 = pnand %p984_p6, %p1147_p4 }
  0xf9   : > { %p990_p12 = por %p989_p11, %p988_p10 }
  0xfa   : > { %p986_p9 = pneg %p985_p7 }
  0xfc   : > { %p991_p13 = pnand %p990_p12, %p986_p9 }
  0xfe   : > { %994 = shalt.err (!%p991_p13)
}
  0xff   : > { %905 = dma.vmem_to_hbm [thread:$0]  (%p1147_p4), %s1196_s22, 128, %s1194_s5, %s711_s8   ;;  %707 = vst.msk [vmem:[%s1188_s24] sm:$0xff] %vm704_vm4, %v706_v38 }
 0x100   : > { %s716_s9 = scalar_lea.sflag [#allocation6], %s1184_s12  ;;  %s995_s10 = scalar_lea.vmem %s1205_s26, 128 }
 0x101   : > { %p996_p0 = scmp.ne.s32.totalorder %s1205_s26, %s995_s10  ;;  %s1081_s11 = smov [#allocation5]  }
 0x102   : > { %s999_s13 = sshll.u32 %s1081_s11, 4  ;;  %s1000_s13 = int_to_ptr.vmem [resolvable:$false] %s999_s13 }
 0x103   : > { %p997_p1 = pnand %p996_p0, %p1147_p4  ;;  %s1001_s14 = scalar_lea.vmem %s1000_s13, 256 }
 0x104   : > { %p1002_p3 = scmp.lt.s32.totalorder %s1205_s26, %s1000_s13  ;;  %p1003_p5 = scmp.lt.s32.totalorder %s1001_s14, %s995_s10 }
 0x105   : > { %p998_p2 = pneg %p997_p1 }
 0x106   : > { %p1004_p6 = por %p1003_p5, %p1002_p3 }
 0x108   : > { %p1005_p7 = pnand %p1004_p6, %p998_p2 }
 0x10a   : > { %1008 = shalt.err (!%p1005_p7)
}
 0x10b   : > { %s1009_s22 = scalar_lea.hbm %s1203_s7, 128  ;;  %s1013_s5 = scalar_lea.hbm %s1277_s4, 256 }
 0x10c   : > { %p1010_p9 = scmp.ne.s32.totalorder %s1203_s7, %s1009_s22  ;;  %p1014_p12 = scmp.lt.s32.totalorder %s1203_s7, %s1277_s4 }
 0x10d   : > { %p1015_p13 = scmp.lt.s32.totalorder %s1013_s5, %s1009_s22 }
 0x10e   : > { %p1011_p10 = pnand %p1010_p9, %p1147_p4 }
 0x10f   : > { %p1016_p0 = por %p1015_p13, %p1014_p12 }
 0x110   : > { %p1012_p11 = pneg %p1011_p10 }
 0x112   : > { %p1017_p1 = pnand %p1016_p0, %p1012_p11 }
 0x114   : > { %1020 = shalt.err (!%p1017_p1)
}
 0x115   : > { %906 = dma.vmem_to_hbm [thread:$0]  (%p1147_p4), %s1205_s26, 128, %s1203_s7, %s716_s9  }
 0x116 PF: > { %p916_p2 = scmp.ge.s32.totalorder %s1075_s20, 2  ;;  %s756_s29 = sand.u32 1, %s1055_s15  }
 0x117   : > { %s757_s30 = scalar_lea.sflag [#allocation4], %s756_s29 }
 0x118   : > { %p910_p3 = pnand %p916_p2, %p1154_p8 }
 0x11a   : > { %p911_p5 = pneg %p910_p3 }
 0x11c   : > { %1046 = dma.done.wait (%p911_p5), %s757_s30, 128  }
 0x11d   : > { %1048 = vsyncadd (%p911_p5), %s757_s30, 4294967168  ;;  %s766_s18 = scalar_lea.sflag [#allocation6], %s756_s29 }
 0x11e   : > { %1050 = dma.done.wait (%p911_p5), %s766_s18, 128  }
 0x11f   : > { %1052 = vsyncadd (%p911_p5), %s766_s18, 4294967168  ;;  %s21_s20 = sadd.s32 1, %s1075_s20   ;;  %s1280_s15 = smov %s1059_s16 }
 0x120   : > { %p18_p6 = scmp.ge.s32.totalorder %s21_s20, 4   ;;  %s1281_s16 = smov %s1063_s17 }
 0x121   : > { %s1282_s17 = smov %s1160_s28  ;;  %s1283_s18 = smov %s1071_s19 }
 0x122   : > { %s1284_s19 = smov %s1286_s23  ;;  %20 = sbr.rel (!%p18_p6) target bundleno = 6 (0x6), region = 88 }
 0x127   :  { %771 = vsyncpa [#allocation4], 1 }
 0x128   :  { %773 = vsyncpa [#allocation4 + $0x1], 1 }
 0x129   :  { %774 = vsyncpa [#allocation6], 1 }
 0x12a   :  { %776 = vsyncpa [#allocation6 + $0x1], 1 }

</bundles_post_ra>
